<compile_context>
chip_gen: v7x
topology: tpu7x:2x2x1
jax: 0.10.0
libtpu: 0.0.40
codegen_flags: <defaults>
</compile_context>

<pallas_src>
import jax
import jax.numpy as jnp
from jax.experimental import pallas as pl
from jax.experimental.pallas import tpu as pltpu


def _quantum_patch_kernel(a0_ref, a1_ref, a2_ref, a3_ref, o_ref):
    """Amplitude-encoding measurement probabilities for a tile of patches.

    a{0..3}_ref: (bt, n) VMEM tiles -- the 4 amplitudes of every patch
                 (TL, TR, BL, BR planes, spatially flattened), native dtype.
    o_ref:       (bt, 4, n) VMEM tile -- normalized squared amplitudes (f32).
    """
    a0 = a0_ref[...].astype(jnp.float32)
    a1 = a1_ref[...].astype(jnp.float32)
    a2 = a2_ref[...].astype(jnp.float32)
    a3 = a3_ref[...].astype(jnp.float32)

    s0 = a0 * a0
    s1 = a1 * a1
    s2 = a2 * a2
    s3 = a3 * a3

    # Pure elementwise 4-way add (no cross-lane reduce).  The 1e-30 floor maps
    # all-zero patches to an all-zero output (the torch reference would 0/0).
    # TODO(synk): confirm the all-zero-patch behavior desired by the encoder.
    denom = jnp.maximum(s0 + s1 + s2 + s3, 1e-30)
    inv = pl.reciprocal(denom, approx=False)   # exact; free under mem-bound

    o_ref[:, 0, :] = s0 * inv
    o_ref[:, 1, :] = s1 * inv
    o_ref[:, 2, :] = s2 * inv
    o_ref[:, 3, :] = s3 * inv


def _pick_batch_tile(batch: int, n_flat: int, in_itemsize: int) -> int:
    """Pick a batch tile (divisor of `batch`).

    Targets a per-grid-step VMEM footprint of ~4-12 MiB (<= ~24 MiB once the
    auto-pipeline double-buffers it, safe on v7x's 64 MiB VMEM), preferring
    sublane-aligned (multiple-of-8) tiles, and only splitting into multiple
    steps when each step stays large enough that the ~0.35us/step overhead
    and the serialization on single-TensorCore chips are negligible.
    """
    # VMEM bytes moved per batch row per step: 4 input planes + f32 output.
    per_row = n_flat * (4 * in_itemsize + 4 * 4)
    budget = 12 * 1024 * 1024      # per-step cap  -> ~24 MiB double-buffered
    min_step = 4 * 1024 * 1024     # don't split into steps smaller than this

    divs = [d for d in range(1, batch + 1) if batch % d == 0]
    aligned = sorted((d for d in divs if d % 8 == 0 and d < batch), reverse=True)

    # Prefer a >=2-step split (feeds both v7x TensorCores) only when each step
    # stays big; largest aligned divisor that fits the budget.
    for d in aligned:
        if min_step <= d * per_row <= budget:
            return d
    # Otherwise a single big step if it fits.
    if batch * per_row <= budget:
        return batch
    # Must split to fit VMEM: largest aligned divisor under budget, then any.
    for d in aligned:
        if d * per_row <= budget:
            return d
    fitting = sorted((d for d in divs if d * per_row <= budget), reverse=True)
    return fitting[0] if fitting else 1


def quantum_conv_layer(x: jax.Array, stride: int = 2) -> jax.Array:
    """x: (B, C, H, W). Returns (B, 4, out_h, out_w) float32."""
    B, C, H, W = x.shape
    assert stride == 2 and H % 2 == 0 and W % 2 == 0, \
        "this kernel implements the stride=2 / even-spatial case"
    out_h = (H - 1) // stride + 1
    out_w = (W - 1) // stride + 1
    n = out_h * out_w
    in_itemsize = jnp.dtype(x.dtype).itemsize

    # ---- glue: channel 0 only; four amplitude planes via strided slices,
    #      flattened lane-dense to (B, n).  allow_input_fusion below lets XLA
    #      fuse these producers into the pallas_call (no extra HBM pass).
    x0 = x[:, 0, :, :]
    a0 = x0[:, 0::2, 0::2].reshape(B, n)
    a1 = x0[:, 0::2, 1::2].reshape(B, n)
    a2 = x0[:, 1::2, 0::2].reshape(B, n)
    a3 = x0[:, 1::2, 1::2].reshape(B, n)

    bt = _pick_batch_tile(B, n, in_itemsize)
    grid = (B // bt,)

    in_spec = pl.BlockSpec((bt, n), lambda i: (i, 0))
    out_spec = pl.BlockSpec((bt, 4, n), lambda i: (i, 0, 0))

    n_patches = B * n
    cost = pl.CostEstimate(
        flops=12 * n_patches,                 # 4 sq + 3 add + 1 max + 4 mul
        transcendentals=n_patches,            # reciprocal per patch
        bytes_accessed=4 * n_patches * in_itemsize + 4 * n_patches * 4,
    )

    out_flat = pl.pallas_call(
        _quantum_patch_kernel,
        out_shape=jax.ShapeDtypeStruct((B, 4, n), jnp.float32),
        grid_spec=pltpu.PrefetchScalarGridSpec(
            num_scalar_prefetch=0,
            grid=grid,
            in_specs=[in_spec, in_spec, in_spec, in_spec],
            out_specs=out_spec,
        ),
        compiler_params=pltpu.CompilerParams(
            dimension_semantics=("parallel",),
            vmem_limit_bytes=48 * 1024 * 1024,   # above 16/32 MiB scoped defaults
            allow_input_fusion=[True, True, True, True],
        ),
        cost_estimate=cost,
    )(a0, a1, a2, a3)

    # Contiguous reshape (free): (B, 4, oh*ow) -> (B, 4, oh, ow).
    return out_flat.reshape(B, 4, out_h, out_w)


if __name__ == "__main__":
    key = jax.random.PRNGKey(0)
    B, C, H, W = 2, 4, 16, 16
    x = jax.random.normal(key, (B, C, H, W), dtype=jnp.float32)

    fn = jax.jit(lambda v: quantum_conv_layer(v, stride=2))
    y = jax.block_until_ready(fn(x))

    assert y.shape == (B, 4, H // 2, W // 2), y.shape

    # pure-JAX reference: normalized squared amplitudes of each 2x2 patch
    x0 = x[:, 0]
    amps = jnp.stack([x0[:, 0::2, 0::2], x0[:, 0::2, 1::2],
                      x0[:, 1::2, 0::2], x0[:, 1::2, 1::2]], axis=1)
    sq = amps * amps
    ref = sq / jnp.maximum(jnp.sum(sq, axis=1, keepdims=True), 1e-30)
    max_err = float(jnp.max(jnp.abs(y - ref)))
    assert max_err < 1e-5, max_err

    # per-patch measurement probabilities sum to 1
    sums = jnp.sum(y, axis=1)
    assert jnp.allclose(sums, jnp.ones_like(sums), atol=1e-5), "probs must sum to 1"

    print("KERNEL_OK")
</pallas_src>

<mosaic_0001>
module attributes {stable_mosaic.version = 11 : i64} {
  func.func @_quantum_patch_kernel(%arg0: i32, %arg1: memref<2x64xf32, #tpu.memory_space<vmem>>, %arg2: memref<2x64xf32, #tpu.memory_space<vmem>>, %arg3: memref<2x64xf32, #tpu.memory_space<vmem>>, %arg4: memref<2x64xf32, #tpu.memory_space<vmem>>, %arg5: memref<2x4x64xf32, #tpu.memory_space<vmem>>) attributes {dimension_semantics = [#tpu.dimension_semantics<parallel>], iteration_bounds = array<i64: 1>, scalar_prefetch = 0 : i64, scratch_operands = 0 : i64, tpu.core_type = #tpu.core_type<tc>, window_params = [{transform_indices = @transform_0, window_bounds = array<i64: 2, 64>}, {transform_indices = @transform_1, window_bounds = array<i64: 2, 64>}, {transform_indices = @transform_2, window_bounds = array<i64: 2, 64>}, {transform_indices = @transform_3, window_bounds = array<i64: 2, 64>}, {transform_indices = @transform_4, window_bounds = array<i64: 2, 4, 64>}]} {
    %c0 = arith.constant 0 : index
    %c0_0 = arith.constant 0 : index
    %0 = vector.load %arg1[%c0, %c0_0] : memref<2x64xf32, #tpu.memory_space<vmem>>, vector<2x64xf32>
    %c0_1 = arith.constant 0 : index
    %c0_2 = arith.constant 0 : index
    %1 = vector.load %arg2[%c0_1, %c0_2] : memref<2x64xf32, #tpu.memory_space<vmem>>, vector<2x64xf32>
    %c0_3 = arith.constant 0 : index
    %c0_4 = arith.constant 0 : index
    %2 = vector.load %arg3[%c0_3, %c0_4] : memref<2x64xf32, #tpu.memory_space<vmem>>, vector<2x64xf32>
    %c0_5 = arith.constant 0 : index
    %c0_6 = arith.constant 0 : index
    %3 = vector.load %arg4[%c0_5, %c0_6] : memref<2x64xf32, #tpu.memory_space<vmem>>, vector<2x64xf32>
    %4 = arith.mulf %0, %0 : vector<2x64xf32>
    %5 = arith.mulf %1, %1 : vector<2x64xf32>
    %6 = arith.mulf %2, %2 : vector<2x64xf32>
    %7 = arith.mulf %3, %3 : vector<2x64xf32>
    %8 = arith.addf %4, %5 : vector<2x64xf32>
    %9 = arith.addf %8, %6 : vector<2x64xf32>
    %10 = arith.addf %9, %7 : vector<2x64xf32>
    %cst = arith.constant 1.000000e-30 : f32
    %11 = vector.broadcast %cst : f32 to vector<2x64xf32>
    %12 = arith.maximumf %10, %11 : vector<2x64xf32>
    %13 = tpu.reciprocal %12 : vector<2x64xf32> -> vector<2x64xf32>
    %14 = arith.mulf %4, %13 : vector<2x64xf32>
    %c0_7 = arith.constant 0 : index
    %c0_8 = arith.constant 0 : index
    %c0_9 = arith.constant 0 : index
    %15 = vector.load %arg5[%c0_7, %c0_8, %c0_9] : memref<2x4x64xf32, #tpu.memory_space<vmem>>, vector<2x1x64xf32>
    %16 = vector.shape_cast %15 : vector<2x1x64xf32> to vector<2x64xf32>
    %17 = vector.shape_cast %14 : vector<2x64xf32> to vector<2x1x64xf32>
    tpu.vector_store %arg5[%c0_7, %c0_8, %c0_9], %17 {strides = array<i32>} : memref<2x4x64xf32, #tpu.memory_space<vmem>>, vector<2x1x64xf32>,
    %18 = arith.mulf %5, %13 : vector<2x64xf32>
    %c0_10 = arith.constant 0 : index
    %c1 = arith.constant 1 : index
    %c0_11 = arith.constant 0 : index
    %19 = vector.load %arg5[%c0_10, %c1, %c0_11] : memref<2x4x64xf32, #tpu.memory_space<vmem>>, vector<2x1x64xf32>
    %20 = vector.shape_cast %19 : vector<2x1x64xf32> to vector<2x64xf32>
    %21 = vector.shape_cast %18 : vector<2x64xf32> to vector<2x1x64xf32>
    tpu.vector_store %arg5[%c0_10, %c1, %c0_11], %21 {strides = array<i32>} : memref<2x4x64xf32, #tpu.memory_space<vmem>>, vector<2x1x64xf32>,
    %22 = arith.mulf %6, %13 : vector<2x64xf32>
    %c0_12 = arith.constant 0 : index
    %c2 = arith.constant 2 : index
    %c0_13 = arith.constant 0 : index
    %23 = vector.load %arg5[%c0_12, %c2, %c0_13] : memref<2x4x64xf32, #tpu.memory_space<vmem>>, vector<2x1x64xf32>
    %24 = vector.shape_cast %23 : vector<2x1x64xf32> to vector<2x64xf32>
    %25 = vector.shape_cast %22 : vector<2x64xf32> to vector<2x1x64xf32>
    tpu.vector_store %arg5[%c0_12, %c2, %c0_13], %25 {strides = array<i32>} : memref<2x4x64xf32, #tpu.memory_space<vmem>>, vector<2x1x64xf32>,
    %26 = arith.mulf %7, %13 : vector<2x64xf32>
    %c0_14 = arith.constant 0 : index
    %c3 = arith.constant 3 : index
    %c0_15 = arith.constant 0 : index
    %27 = vector.load %arg5[%c0_14, %c3, %c0_15] : memref<2x4x64xf32, #tpu.memory_space<vmem>>, vector<2x1x64xf32>
    %28 = vector.shape_cast %27 : vector<2x1x64xf32> to vector<2x64xf32>
    %29 = vector.shape_cast %26 : vector<2x64xf32> to vector<2x1x64xf32>
    tpu.vector_store %arg5[%c0_14, %c3, %c0_15], %29 {strides = array<i32>} : memref<2x4x64xf32, #tpu.memory_space<vmem>>, vector<2x1x64xf32>,
    return
  }
  func.func @transform_0(%arg0: i32) -> (i32, i32) {
    %c0_i32 = arith.constant 0 : i32
    %c0_i32_0 = arith.constant 0 : i32
    return %arg0, %c0_i32 : i32, i32
  }
  func.func @transform_1(%arg0: i32) -> (i32, i32) {
    %c0_i32 = arith.constant 0 : i32
    %c0_i32_0 = arith.constant 0 : i32
    return %arg0, %c0_i32 : i32, i32
  }
  func.func @transform_2(%arg0: i32) -> (i32, i32) {
    %c0_i32 = arith.constant 0 : i32
    %c0_i32_0 = arith.constant 0 : i32
    return %arg0, %c0_i32 : i32, i32
  }
  func.func @transform_3(%arg0: i32) -> (i32, i32) {
    %c0_i32 = arith.constant 0 : i32
    %c0_i32_0 = arith.constant 0 : i32
    return %arg0, %c0_i32 : i32, i32
  }
  func.func @transform_4(%arg0: i32) -> (i32, i32, i32) {
    %c0_i32 = arith.constant 0 : i32
    %c0_i32_0 = arith.constant 0 : i32
    %c0_i32_1 = arith.constant 0 : i32
    return %arg0, %c0_i32, %c0_i32_0 : i32, i32, i32
  }
}

</mosaic_0001>

<bundles_post_ra>
// kernel: _lambda_.1
= control target key start
LH: loop header
LB: loop body
LE: loop exit
PB: predicated region body
PF: predicated region fallthrough
CT: control target
= control target key end

     0   :  { %v150_v12 = vmov 1966171168   ;;  %v35_v14 = vlaneseq  ;;  %vm56_vm0 = vcmask 516096   ;;  %s220_s0 = inlined_call_operand.vmem [shape: f32[2,64], index: 0, kind: input, shape index: {}]   ;;  %s221_s1 = inlined_call_operand.vmem [shape: f32[2,64], index: 1, kind: input, shape index: {}]   ;;  %s222_s2 = inlined_call_operand.vmem [shape: f32[2,64], index: 2, kind: input, shape index: {}]   ;;  %s223_s3 = inlined_call_operand.vmem [shape: f32[2,64], index: 3, kind: input, shape index: {}]   ;;  %s224_s4 = inlined_call_operand.vmem [shape: f32[2,4,64], index: 4, kind: output, shape index: {}]  }
   0x1   :  { %v17_v0 = vld [vmem:[%s220_s0] sm:$0x3]  ;;  %v33_v13 = vunpack.c.l.s4 %v150_v12 }
   0x2   :  { %v18_v1 = vld [vmem:[%s221_s1] sm:$0x3]  ;;  %v21_v4 = vmul.f32 %v17_v0, %v17_v0  ;;  %v36_v16 = vshrl.u32 %v35_v14, 7 }
   0x3   :  { %v19_v2 = vld [vmem:[%s222_s2] sm:$0x3]  ;;  %v22_v5 = vmul.f32 %v18_v1, %v18_v1  ;;  %v34_v15 = vunpack.c.0.s8 %v33_v13 }
   0x4   :  { %v20_v3 = vld [vmem:[%s223_s3] sm:$0x3]  ;;  %v23_v6 = vmul.f32 %v19_v2, %v19_v2 }
   0x5   :  { %v24_v7 = vmul.f32 %v20_v3, %v20_v3  ;;  %v25_v8 = vadd.f32 %v22_v5, %v21_v4  ;;  %v37_v17 = vsub.s32 %v34_v15, %v36_v16 }
   0x7   :  { %v26_v9 = vadd.f32 %v25_v8, %v23_v6 }
   0x9   :  { %v27_v10 = vadd.f32 %v26_v9, %v24_v7 }
   0xb   :  { %v28_v11 = vmax.f32 %v27_v10, 1e-30 }
   0xd   :  { %148 = vrcp.f32 %v28_v11 }
  0x17   :  { %v149_v18 = vpop.eup %148 }
  0x18   :  { %v30_v19 = vmul.f32 %v149_v18, %v21_v4  ;;  %v59_v20 = vmul.f32 %v149_v18, %v22_v5  ;;  %v87_v21 = vmul.f32 %v149_v18, %v23_v6  ;;  %v115_v22 = vmul.f32 %v149_v18, %v24_v7 }
  0x1a   :  { %v38_v23 = vrot.slane %v30_v19, %v37_v17  ;;  %v67_v24 = vrot.slane %v59_v20, %v37_v17  ;;  %v95_v25 = vrot.slane %v87_v21, %v37_v17  ;;  %v123_v26 = vrot.slane %v115_v22, %v37_v17 }
  0x1c   :  { %v46_v27 = vrot.slane %v38_v23, %v37_v17  ;;  %v39_v28 = vcombine.high %v38_v23, %v38_v23  ;;  %v75_v29 = vrot.slane %v67_v24, %v37_v17  ;;  %v68_v30 = vcombine.high %v67_v24, %v67_v24 }
  0x1d   :  { %v103_v31 = vrot.slane %v95_v25, %v37_v17  ;;  %v96_v32 = vcombine.high %v95_v25, %v95_v25  ;;  %v131_v33 = vrot.slane %v123_v26, %v37_v17  ;;  %v124_v34 = vcombine.high %v123_v26, %v123_v26 }
  0x1e   :  { %57 = vst.msk [vmem:[%s224_s4] sm:$0x1] %vm56_vm0, %v46_v27  ;;  %v53_v35 = vrot.slane %v39_v28, %v37_v17  ;;  %85 = vst.msk [vmem:[%s224_s4 + $0x1] sm:$0x1] %vm56_vm0, %v75_v29  ;;  %v82_v36 = vrot.slane %v68_v30, %v37_v17 }
  0x1f   :  { %113 = vst.msk [vmem:[%s224_s4 + $0x2] sm:$0x1] %vm56_vm0, %v103_v31  ;;  %v110_v37 = vrot.slane %v96_v32, %v37_v17  ;;  %141 = vst.msk [vmem:[%s224_s4 + $0x3] sm:$0x1] %vm56_vm0, %v131_v33  ;;  %v138_v38 = vrot.slane %v124_v34, %v37_v17 }
  0x20   :  { %58 = vst.msk [vmem:[%s224_s4 + $0x4] sm:$0x1] %vm56_vm0, %v53_v35  ;;  %86 = vst.msk [vmem:[%s224_s4 + $0x5] sm:$0x1] %vm56_vm0, %v82_v36 }
  0x21   :  { %114 = vst.msk [vmem:[%s224_s4 + $0x6] sm:$0x1] %vm56_vm0, %v110_v37  ;;  %142 = vst.msk [vmem:[%s224_s4 + $0x7] sm:$0x1] %vm56_vm0, %v138_v38 }

</bundles_post_ra>
